<compile_context>
chip_gen: v7x
topology: tpu7x:2x2x1
jax: 0.10.0
libtpu: 0.0.40
codegen_flags: <defaults>
</compile_context>

<pallas_src>
import functools

import jax
import jax.numpy as jnp
from jax.experimental import pallas as pl
from jax.experimental.pallas import tpu as pltpu

BN_EPS = 1e-5     # torch.nn.BatchNorm2d default
LANE = 128        # TPU lane width


def _round_up(x, m):
    return (x + m - 1) // m * m


def _pick_vmem_limit():
    """Per-generation VMEM budget: ~3/4 of physical (v5e/v6e: 128 MiB, v7x: 64 MiB)."""
    cap = 64 * 1024 * 1024
    try:
        cap = int(getattr(pltpu.get_tpu_info(), "vmem_capacity_bytes", cap))
    except Exception:
        pass
    return min((cap * 3) // 4, 100 * 1024 * 1024)


# ---------------------------------------------------------------------------
# Pass 1: conv-as-GEMM tile + per-image / per-channel sum & sum-of-squares.
# ---------------------------------------------------------------------------
def gemm_stats_kernel(p_ref, w_ref, y_ref, sum_ref, ssq_ref):
    m = pl.program_id(1)

    # bf16 operands, f32 accumulation on the MXU.  shape (C_pad, tile_m)
    y = jnp.dot(w_ref[...], p_ref[...], preferred_element_type=jnp.float32)
    y_ref[...] = y.astype(y_ref.dtype)   # bf16 intermediate: halves the y HBM round trip

    @pl.when(m == 0)
    def _():
        sum_ref[...] = jnp.zeros_like(sum_ref)
        ssq_ref[...] = jnp.zeros_like(ssq_ref)

    # Lane-direction reductions on the f32 tile (stats stay f32). Zero-padded M columns
    # contribute zeros, so dividing by the true M in the wrapper is exact.
    sum_ref[...] += jnp.sum(y, axis=1, keepdims=True)
    ssq_ref[...] += jnp.sum(y * y, axis=1, keepdims=True)


# ---------------------------------------------------------------------------
# Pass 2: folded batch-norm (scale/shift) + optional ReLU, lane-dense stores.
# ---------------------------------------------------------------------------
def bn_relu_kernel(y_ref, scale_ref, shift_ref, o_ref, *, apply_relu):
    out = y_ref[...].astype(jnp.float32) * scale_ref[...] + shift_ref[...]
    if apply_relu:
        out = jnp.maximum(out, 0.0)
    # Drop the padded channels in-kernel (8-aligned f32 sublane slice) so the wrapper
    # epilogue is a plain reshape — no transpose, no channel slice over HBM.
    o_ref[...] = out[: o_ref.shape[0], :]


def _im2col_nkm(x_bf16, kh, kw, stride, padding):
    """x: (N, C, H, W) bf16 -> patches (N, K, OH*OW), K = C*kh*kw (C-major, then kh, kw)."""
    N, C, H, W = x_bf16.shape
    xp = jnp.pad(x_bf16, ((0, 0), (0, 0), (padding, padding), (padding, padding)))
    OH = (H + 2 * padding - kh) // stride + 1
    OW = (W + 2 * padding - kw) // stride + 1
    taps = []
    for i in range(kh):
        for j in range(kw):
            taps.append(xp[:, :, i:i + stride * OH:stride, j:j + stride * OW:stride])
    col = jnp.stack(taps, axis=2)                        # (N, C, kh*kw, OH, OW)
    return col.reshape(N, C * kh * kw, OH * OW), OH, OW  # contiguous merge, no transpose


def cnn_block_forward(x, weight, gamma, beta, *, stride=1, padding=0, is_trans=True,
                      tile_m1=None, tile_m2=None):
    """Equivalent of CNNBlock.forward. x: NCHW f32, weight: OIHW (bias=False)."""
    N, C_in, H, W = x.shape
    out_ch, _, kh, kw = weight.shape

    patches, OH, OW = _im2col_nkm(x.astype(jnp.bfloat16), kh, kw, stride, padding)
    K = C_in * kh * kw
    OHW = OH * OW
    M = N * OHW                                           # true count per channel

    # Padding: K -> 16 (bf16 sublane pack; Mosaic pads MXU contraction internally),
    #          C_out -> 16 (bf16 min tile (16,128)), OH*OW -> pass-2 tile multiple.
    K_pad = _round_up(K, 16)
    C_pad = _round_up(out_ch, 16)

    vmem_limit = _pick_vmem_limit()
    budget = vmem_limit // 2                              # headroom for Mosaic scratch
    OHW_128 = _round_up(OHW, LANE)

    # Pass-2 tile: pure FMA+max epilogue -> big blocks to amortize per-step overhead.
    if tile_m2 is None:
        tile_m2 = 4096
    tile_m2 = min(max(LANE, _round_up(tile_m2, LANE)), OHW_128)
    bytes_per_lane2 = 4 * C_pad + 8 * out_ch              # dbl-buffered bf16 in + f32 out
    tile_m2 = max(LANE, min(tile_m2, (budget // bytes_per_lane2) // LANE * LANE))

    # Pass-1 tile: bounded by double-buffered patch + y blocks (+ weight) in VMEM.
    if tile_m1 is None:
        w_bytes = 4 * C_pad * K_pad                       # double-buffered bf16 weight
        bytes_per_lane1 = 4 * K_pad + 4 * C_pad           # dbl-buffered bf16 p + bf16 y
        tile_m1 = max(LANE,
                      (max(budget - w_bytes, 0) // bytes_per_lane1) // LANE * LANE)
    tile_m1 = min(max(LANE, _round_up(tile_m1, LANE)), tile_m2)
    while tile_m2 % tile_m1:                              # tile_m1 must divide tile_m2
        tile_m1 -= LANE

    OHW_pad = _round_up(OHW, tile_m2)
    n_t1 = OHW_pad // tile_m1
    n_t2 = OHW_pad // tile_m2

    # Single-pass padded operand construction (already bf16; zero pads don't perturb stats).
    p_b = jnp.pad(patches, ((0, 0), (0, K_pad - K), (0, OHW_pad - OHW)))
    w_b = jnp.pad(weight.reshape(out_ch, K).astype(jnp.bfloat16),
                  ((0, C_pad - out_ch), (0, K_pad - K)))

    # ---- Pass 1: conv GEMM tiles + per-image per-channel statistics. ----
    y, sums, ssqs = pl.pallas_call(
        gemm_stats_kernel,
        out_shape=(jax.ShapeDtypeStruct((N, C_pad, OHW_pad), jnp.bfloat16),
                   jax.ShapeDtypeStruct((N, C_pad, 1), jnp.float32),
                   jax.ShapeDtypeStruct((N, C_pad, 1), jnp.float32)),
        grid_spec=pltpu.PrefetchScalarGridSpec(
            num_scalar_prefetch=0,
            grid=(N, n_t1),
            in_specs=[pl.BlockSpec((None, K_pad, tile_m1), lambda n, m: (n, 0, m)),
                      pl.BlockSpec((C_pad, K_pad), lambda n, m: (0, 0))],
            out_specs=(pl.BlockSpec((None, C_pad, tile_m1), lambda n, m: (n, 0, m)),
                       pl.BlockSpec((None, C_pad, 1), lambda n, m: (n, 0, 0)),
                       pl.BlockSpec((None, C_pad, 1), lambda n, m: (n, 0, 0)))),
        compiler_params=pltpu.CompilerParams(
            dimension_semantics=("parallel", "arbitrary"),  # stats accumulate across M tiles
            vmem_limit_bytes=vmem_limit),
    )(p_b, w_b)

    # ---- Fold BN (train-mode biased batch stats) into one scale & shift per channel. ----
    # TODO(synk): E[y^2]-E[y]^2 in f32 is cancellation-prone at very large M when |mean|>>std;
    #             switch to a shifted / pairwise combine of the per-image partials if needed.
    sum_c = jnp.sum(sums[:, :, 0], axis=0)
    ssq_c = jnp.sum(ssqs[:, :, 0], axis=0)
    mean = sum_c / M
    var = jnp.maximum(ssq_c / M - mean * mean, 0.0)
    gamma_pad = jnp.pad(gamma.astype(jnp.float32), (0, C_pad - out_ch))
    beta_pad = jnp.pad(beta.astype(jnp.float32), (0, C_pad - out_ch))
    scale = gamma_pad * jax.lax.rsqrt(var + BN_EPS)
    shift = beta_pad - mean * scale

    # ---- Pass 2: normalize + ReLU, big lane-dense tiles, direct (N, C_out, OHW) layout. ----
    out3 = pl.pallas_call(
        functools.partial(bn_relu_kernel, apply_relu=is_trans),
        out_shape=jax.ShapeDtypeStruct((N, out_ch, OHW_pad), jnp.float32),
        grid_spec=pltpu.PrefetchScalarGridSpec(
            num_scalar_prefetch=0,
            grid=(N, n_t2),
            in_specs=[pl.BlockSpec((None, C_pad, tile_m2), lambda n, m: (n, 0, m)),
                      pl.BlockSpec((C_pad, 1), lambda n, m: (0, 0)),
                      pl.BlockSpec((C_pad, 1), lambda n, m: (0, 0))],
            out_specs=pl.BlockSpec((None, out_ch, tile_m2), lambda n, m: (n, 0, m))),
        compiler_params=pltpu.CompilerParams(
            dimension_semantics=("parallel", "parallel"),
            vmem_limit_bytes=vmem_limit),
    )(y, scale.reshape(C_pad, 1), shift.reshape(C_pad, 1))

    # (N, C_out, OHW_pad) -> NCHW.  No transpose; slice is a no-op when OHW_pad == OH*OW.
    return out3[:, :, :OHW].reshape(N, out_ch, OH, OW)


def _reference(x, weight, gamma, beta, *, stride, padding, is_trans):
    """Pure-JAX f32 reference of the same forward semantics (sanity check)."""
    y = jax.lax.conv_general_dilated(
        x, weight, window_strides=(stride, stride),
        padding=[(padding, padding), (padding, padding)],
        dimension_numbers=("NCHW", "OIHW", "NCHW"))
    mean = y.mean(axis=(0, 2, 3), keepdims=True)
    var = jnp.square(y - mean).mean(axis=(0, 2, 3), keepdims=True)
    out = (y - mean) * jax.lax.rsqrt(var + BN_EPS)
    out = out * gamma.reshape(1, -1, 1, 1) + beta.reshape(1, -1, 1, 1)
    if is_trans:
        out = jnp.maximum(out, 0.0)
    return out


if __name__ == "__main__":
    # CNNBlock(in_ch=4, out_ch=8, kernel_size=3, stride=1, padding=1, bias=False, is_trans=True)
    N, in_ch, H, W = 2, 4, 16, 16
    out_ch, ksize, stride, padding = 8, 3, 1, 1

    key = jax.random.PRNGKey(0)
    kx, kwt = jax.random.split(key)
    x = jax.random.normal(kx, (N, in_ch, H, W), dtype=jnp.float32)
    weight = 0.1 * jax.random.normal(kwt, (out_ch, in_ch, ksize, ksize), dtype=jnp.float32)
    gamma = jnp.ones((out_ch,), dtype=jnp.float32)   # BatchNorm2d defaults
    beta = jnp.zeros((out_ch,), dtype=jnp.float32)

    # tile_m1=128 at this toy size so the pass-1 grid has 2 M-steps per image
    # (exercises the resident sum/ssq accumulation path across tiles).
    out = cnn_block_forward(x, weight, gamma, beta,
                            stride=stride, padding=padding, is_trans=True, tile_m1=128)
    out = jax.block_until_ready(out)

    ref = _reference(x, weight, gamma, beta,
                     stride=stride, padding=padding, is_trans=True)
    assert out.shape == (N, out_ch, H, W)
    # bf16 GEMM inputs + bf16 y intermediate (f32 accumulation, f32 stats/BN) -> intentional
    # accuracy tradeoff vs the f32 reference; tolerance chosen accordingly.
    assert jnp.allclose(out, ref, atol=3e-2, rtol=3e-2), "mismatch vs reference"

    print("KERNEL_OK")
</pallas_src>

<mosaic_0001>
module attributes {stable_mosaic.version = 11 : i64} {
  func.func @gemm_stats_kernel(%arg0: i32, %arg1: i32, %arg2: memref<1x48x128xbf16, #tpu.memory_space<vmem>>, %arg3: memref<16x48xbf16, #tpu.memory_space<vmem>>, %arg4: memref<1x16x128xbf16, #tpu.memory_space<vmem>>, %arg5: memref<1x16x1xf32, #tpu.memory_space<vmem>>, %arg6: memref<1x16x1xf32, #tpu.memory_space<vmem>>) attributes {dimension_semantics = [#tpu.dimension_semantics<parallel>, #tpu.dimension_semantics<arbitrary>], iteration_bounds = array<i64: 2, 2>, scalar_prefetch = 0 : i64, scratch_operands = 0 : i64, tpu.core_type = #tpu.core_type<tc>, window_params = [{transform_indices = @transform_0, window_bounds = array<i64: 1, 48, 128>}, {pipeline_mode = #tpu.pipeline_mode<synchronous>, transform_indices = @transform_1, window_bounds = array<i64: 16, 48>}, {transform_indices = @transform_2, window_bounds = array<i64: 1, 16, 128>}, {transform_indices = @transform_3, window_bounds = array<i64: 1, 16, 1>}, {transform_indices = @transform_4, window_bounds = array<i64: 1, 16, 1>}]} {
    %c0 = arith.constant 0 : index
    %c0_0 = arith.constant 0 : index
    %0 = vector.load %arg3[%c0, %c0_0] : memref<16x48xbf16, #tpu.memory_space<vmem>>, vector<16x48xbf16>
    %c0_1 = arith.constant 0 : index
    %c0_2 = arith.constant 0 : index
    %c0_3 = arith.constant 0 : index
    %1 = vector.load %arg2[%c0_1, %c0_2, %c0_3] : memref<1x48x128xbf16, #tpu.memory_space<vmem>>, vector<1x48x128xbf16>
    %2 = vector.shape_cast %1 : vector<1x48x128xbf16> to vector<48x128xbf16>
    %cst = arith.constant dense<0.000000e+00> : vector<16x128xf32>
    %3 = tpu.matmul %0, %2, %cst {dimension_numbers = #tpu.dot_dimension_numbers<[1], [0], [0], [1], [0, 0, 1, 1], [], []>} : vector<16x48xbf16>, vector<48x128xbf16>, vector<16x128xf32> -> vector<16x128xf32>
    %4 = arith.truncf %3 : vector<16x128xf32> to vector<16x128xbf16>
    %c0_4 = arith.constant 0 : index
    %c0_5 = arith.constant 0 : index
    %c0_6 = arith.constant 0 : index
    %5 = vector.load %arg4[%c0_4, %c0_5, %c0_6] : memref<1x16x128xbf16, #tpu.memory_space<vmem>>, vector<1x16x128xbf16>
    %6 = vector.shape_cast %5 : vector<1x16x128xbf16> to vector<16x128xbf16>
    %7 = vector.shape_cast %4 : vector<16x128xbf16> to vector<1x16x128xbf16>
    tpu.vector_store %arg4[%c0_4, %c0_5, %c0_6], %7 {strides = array<i32>} : memref<1x16x128xbf16, #tpu.memory_space<vmem>>, vector<1x16x128xbf16>,
    %c0_i32 = arith.constant 0 : i32
    %8 = arith.cmpi eq, %arg1, %c0_i32 : i32
    %9 = arith.extui %8 : i1 to i32
    %c0_i32_7 = arith.constant 0 : i32
    %10 = arith.cmpi ne, %9, %c0_i32_7 : i32
    scf.if %10 {
      %cst_22 = arith.constant 0.000000e+00 : f32
      %28 = vector.broadcast %cst_22 : f32 to vector<16x1xf32>
      %c0_23 = arith.constant 0 : index
      %c0_24 = arith.constant 0 : index
      %c0_25 = arith.constant 0 : index
      %29 = vector.load %arg5[%c0_23, %c0_24, %c0_25] : memref<1x16x1xf32, #tpu.memory_space<vmem>>, vector<1x16x1xf32>
      %30 = vector.shape_cast %29 : vector<1x16x1xf32> to vector<16x1xf32>
      %31 = vector.shape_cast %28 : vector<16x1xf32> to vector<1x16x1xf32>
      tpu.vector_store %arg5[%c0_23, %c0_24, %c0_25], %31 {strides = array<i32>} : memref<1x16x1xf32, #tpu.memory_space<vmem>>, vector<1x16x1xf32>,
      %cst_26 = arith.constant 0.000000e+00 : f32
      %32 = vector.broadcast %cst_26 : f32 to vector<16x1xf32>
      %c0_27 = arith.constant 0 : index
      %c0_28 = arith.constant 0 : index
      %c0_29 = arith.constant 0 : index
      %33 = vector.load %arg6[%c0_27, %c0_28, %c0_29] : memref<1x16x1xf32, #tpu.memory_space<vmem>>, vector<1x16x1xf32>
      %34 = vector.shape_cast %33 : vector<1x16x1xf32> to vector<16x1xf32>
      %35 = vector.shape_cast %32 : vector<16x1xf32> to vector<1x16x1xf32>
      tpu.vector_store %arg6[%c0_27, %c0_28, %c0_29], %35 {strides = array<i32>} : memref<1x16x1xf32, #tpu.memory_space<vmem>>, vector<1x16x1xf32>,
    } else {
    }
    %c0_8 = arith.constant 0 : index
    %c0_9 = arith.constant 0 : index
    %c0_10 = arith.constant 0 : index
    %11 = vector.load %arg5[%c0_8, %c0_9, %c0_10] : memref<1x16x1xf32, #tpu.memory_space<vmem>>, vector<1x16x1xf32>
    %12 = vector.shape_cast %11 : vector<1x16x1xf32> to vector<16x1xf32>
    %cst_11 = arith.constant dense<0.000000e+00> : vector<16xf32>
    %13 = vector.multi_reduction <add>, %3, %cst_11 [1] : vector<16x128xf32> to vector<16xf32>
    %14 = vector.shape_cast %13 : vector<16xf32> to vector<16x1xf32>
    %15 = arith.addf %12, %14 : vector<16x1xf32>
    %c0_12 = arith.constant 0 : index
    %c0_13 = arith.constant 0 : index
    %c0_14 = arith.constant 0 : index
    %16 = vector.load %arg5[%c0_12, %c0_13, %c0_14] : memref<1x16x1xf32, #tpu.memory_space<vmem>>, vector<1x16x1xf32>
    %17 = vector.shape_cast %16 : vector<1x16x1xf32> to vector<16x1xf32>
    %18 = vector.shape_cast %15 : vector<16x1xf32> to vector<1x16x1xf32>
    tpu.vector_store %arg5[%c0_12, %c0_13, %c0_14], %18 {strides = array<i32>} : memref<1x16x1xf32, #tpu.memory_space<vmem>>, vector<1x16x1xf32>,
    %c0_15 = arith.constant 0 : index
    %c0_16 = arith.constant 0 : index
    %c0_17 = arith.constant 0 : index
    %19 = vector.load %arg6[%c0_15, %c0_16, %c0_17] : memref<1x16x1xf32, #tpu.memory_space<vmem>>, vector<1x16x1xf32>
    %20 = vector.shape_cast %19 : vector<1x16x1xf32> to vector<16x1xf32>
    %21 = arith.mulf %3, %3 : vector<16x128xf32>
    %cst_18 = arith.constant dense<0.000000e+00> : vector<16xf32>
    %22 = vector.multi_reduction <add>, %21, %cst_18 [1] : vector<16x128xf32> to vector<16xf32>
    %23 = vector.shape_cast %22 : vector<16xf32> to vector<16x1xf32>
    %24 = arith.addf %20, %23 : vector<16x1xf32>
    %c0_19 = arith.constant 0 : index
    %c0_20 = arith.constant 0 : index
    %c0_21 = arith.constant 0 : index
    %25 = vector.load %arg6[%c0_19, %c0_20, %c0_21] : memref<1x16x1xf32, #tpu.memory_space<vmem>>, vector<1x16x1xf32>
    %26 = vector.shape_cast %25 : vector<1x16x1xf32> to vector<16x1xf32>
    %27 = vector.shape_cast %24 : vector<16x1xf32> to vector<1x16x1xf32>
    tpu.vector_store %arg6[%c0_19, %c0_20, %c0_21], %27 {strides = array<i32>} : memref<1x16x1xf32, #tpu.memory_space<vmem>>, vector<1x16x1xf32>,
    return
  }
  func.func @transform_0(%arg0: i32, %arg1: i32) -> (i32, i32, i32) {
    %c0_i32 = arith.constant 0 : i32
    %c0_i32_0 = arith.constant 0 : i32
    return %arg0, %c0_i32, %arg1 : i32, i32, i32
  }
  func.func @transform_1(%arg0: i32, %arg1: i32) -> (i32, i32) {
    %c0_i32 = arith.constant 0 : i32
    %c0_i32_0 = arith.constant 0 : i32
    %c0_i32_1 = arith.constant 0 : i32
    return %c0_i32, %c0_i32_0 : i32, i32
  }
  func.func @transform_2(%arg0: i32, %arg1: i32) -> (i32, i32, i32) {
    %c0_i32 = arith.constant 0 : i32
    %c0_i32_0 = arith.constant 0 : i32
    return %arg0, %c0_i32, %arg1 : i32, i32, i32
  }
  func.func @transform_3(%arg0: i32, %arg1: i32) -> (i32, i32, i32) {
    %c0_i32 = arith.constant 0 : i32
    %c0_i32_0 = arith.constant 0 : i32
    %c0_i32_1 = arith.constant 0 : i32
    return %arg0, %c0_i32, %c0_i32_0 : i32, i32, i32
  }
  func.func @transform_4(%arg0: i32, %arg1: i32) -> (i32, i32, i32) {
    %c0_i32 = arith.constant 0 : i32
    %c0_i32_0 = arith.constant 0 : i32
    %c0_i32_1 = arith.constant 0 : i32
    return %arg0, %c0_i32, %c0_i32_0 : i32, i32, i32
  }
}

</mosaic_0001>

<bundles_post_ra>
// kernel: tpu_custom_call.1
= control target key start
LH: loop header
LB: loop body
LE: loop exit
PB: predicated region body
PF: predicated region fallthrough
CT: control target
= control target key end

     0   :  { %s1197_s0 = inlined_call_operand.hbm [shape: bf16[2,48,256], index: 0, kind: input, shape index: {}]   ;;  %s1198_s1 = inlined_call_operand.hbm [shape: bf16[16,48], index: 1, kind: input, shape index: {}]   ;;  %s1199_s2 = inlined_call_operand.hbm [shape: bf16[2,16,256], index: 2, kind: output, shape index: {0}]   ;;  %s1200_s3 = inlined_call_operand.vmem [shape: f32[2,16,1], index: 3, kind: output, shape index: {1}]   ;;  %s1201_s4 = inlined_call_operand.vmem [shape: f32[2,16,1], index: 4, kind: output, shape index: {2}]  }
   0x1   :  { %1212 = sst [smem:[#allocation13_spill]] %s1198_s1 }
   0x2   :  { %10 = vsyncpa [#allocation3], 0 }
   0x3   :  { %12 = vsyncpa [#allocation3 + $0x1], 0 }
   0x4   :  { %13 = vsyncpa [#allocation6], 0 }
   0x5   :  { %14 = vsyncpa [#allocation4], 0 }
   0x6   :  { %16 = vsyncpa [#allocation4 + $0x1], 0  ;;  %s924_s15 = smov 0   ;;  %s926_s16 = smov 0  }
   0x7   :  { %s928_s17 = smov 0   ;;  %s930_s18 = smov 0  }
   0x8   :  { %s932_s19 = smov 0   ;;  %s934_s20 = smov 0  }
   0x9   :  { %s936_s21 = smov 0   ;;  %s938_s22 = smov 0  }
   0xa LB: > { %s571_s23 = sadd.s32 4294967295, %s885_s22   ;;  %s572_s24 = sadd.s32 4294967294, %s885_s22   ;;  %s885_s22 = sphi %s938_s22, %s22_s22   ;;  %s881_s21 = sphi %s936_s21, %s1241_s21   ;;  %s877_s20 = sphi %s934_s20, %s1240_s20   ;;  %s873_s19 = sphi %s932_s19, %s1239_s19   ;;  %s869_s18 = sphi %s930_s18, %s1238_s18   ;;  %s865_s17 = sphi %s928_s17, %s1237_s17   ;;  %s861_s16 = sphi %s926_s16, %s1236_s16   ;;  %s857_s15 = sphi %s924_s15, %s1235_s15  }
   0xb   : > { %p50_p0 = scmp.ne.s32.totalorder %s865_s17, %s861_s16  ;;  %p51_p1 = scmp.eq.s32.totalorder %s885_s22, 0 }
   0xc   : > { %p56_p2 = scmp.ne.s32.totalorder %s861_s16, %s857_s15  ;;  %p972_p3 = scmp.eq.s32.totalorder %s571_s23, 0 }
   0xd   : > { %p103_p4 = scmp.eq.s32.totalorder %s571_s23, 3  ;;  %p976_p5 = por %p51_p1, %p50_p0 }
   0xe   : > { %s1213_s26 = scalar_select %p972_p3, 1, 0 }
   0xf   : > { %p109_p6 = scmp.eq.s32.totalorder %s572_s24, 3  ;;  %p982_p7 = por %p972_p3, %p56_p2 }
  0x10   : > { %p986_p8 = por %p103_p4, %p50_p0  ;;  %p573_p10 = scmp.ge.s32.totalorder %s885_s22, 1 }
  0x11   : > { %s1215_s28 = scalar_select %p982_p7, 1, 0 }
  0x12   : > { %s1216_s29 = scalar_select %p986_p8, 1, 0 }
  0x13   : > { %p990_p9 = por %p109_p6, %p56_p2  ;;  %p168_p11 = scmp.lt.s32.totalorder %s885_s22, 5 }
  0x14   : > { %s887_s6 = smov [#allocation5]   ;;  %p644_p0 = scmp.lt.s32.totalorder %s885_s22, 4 }
  0x15   : > { %s1217_s30 = scalar_select %p990_p9, 1, 0 }
  0x16   : > { %p996_p12 = pnand %p573_p10, %p168_p11  ;;  %s180_s7 = sshll.u32 %s887_s6, 4  ;;  %s181_s7 = int_to_ptr.vmem [resolvable:$true] %s180_s7 }
  0x17   : > { %1218 = sst [smem:[#allocation11_spill]] %s1217_s30  ;;  %p1011_p2 = pnand %p644_p0, %p976_p5 }
  0x18   : > { %s1219_s5 = scalar_select %p996_p12, 1, 0 }
  0x19   : > { %p631_p13 = pneg %p996_p12  ;;  %s1222_s1 = sld [smem:[#allocation13_spill]] }
  0x1a   : > { %s1221_s9 = scalar_select %p1011_p2, 1, 0 }
  0x1b   : > { %p1005_p1 = pnand %p631_p13, %p972_p3 }
  0x1d   : > { %p727_p6 = pneg %p1005_p1 }
  0x1f   : > { %s725_s12 = scalar_lea.hbm %s1222_s1, 128 }
  0x20   : > { %p726_p4 = scmp.ne.s32.totalorder %s1222_s1, %s725_s12  ;;  %p732_p13 = scmp.lt.u32.totalorder %s725_s12, %s1222_s1 }
  0x22   : > { %p728_p10 = pnand %p727_p6, %p726_p4 }
  0x24   : > { %p729_p11 = pneg %p728_p10 }
  0x26   : > { %p734_p5 = pnand %p732_p13, %p729_p11 }
  0x28   : > { %737 = shalt.err (!%p734_p5)
}
  0x29   : > { %s738_s27 = scalar_lea.vmem %s181_s7, 128  ;;  %p746_p3 = scmp.lt.s32.totalorder %s181_s7, %s181_s7 }
  0x2a   : > { %p739_p0 = scmp.ne.s32.totalorder %s181_s7, %s738_s27  ;;  %p747_p7 = scmp.lt.s32.totalorder %s738_s27, %s738_s27 }
  0x2c   : > { %p741_p9 = pnand %p739_p0, %p727_p6  ;;  %p748_p12 = por %p747_p7, %p746_p3 }
  0x2e   : > { %p742_p8 = pneg %p741_p9 }
  0x30   : > { %p749_p2 = pnand %p748_p12, %p742_p8 }
  0x32   : > { %752 = shalt.err (!%p749_p2)
}
  0x33   : > { %s1208_s6 = smov 64   ;;  %s1209_s10 = smov 4  }
  0x34   : > { %634 = dma.hbm_to_vmem [thread:$0]  (!%p1005_p1), %s1222_s1, 128, %s181_s7, [#allocation6], %s1208_s6, %s1208_s6, %s1209_s10  }
  0x35   : > { %s31_s13 = sadd.s32 1, %s877_s20  ;;  %s34_s14 = sadd.s32 1, %s881_s21 }
  0x36   : > { %p32_p3 = scmp.ge.s32.totalorder %s31_s13, 2  ;;  %s194_s23 = sand.u32 1, %s865_s17  }
  0x37   : > { %s621_s24 = smul.u32 12, %s881_s21  ;;  %p1224_p12 = scmp.ne.s32.totalorder %s1221_s9, 0 }
  0x38   : > { %s1243_s13 = smov (%p32_p3, %s31_s13), 0  ;;  %s1245_s14 = smov (!%p32_p3, %s34_s14), %s881_s21 }
  0x39   : > { %1223 = sst [smem:[#allocation12_spill]] %s1243_s13  ;;  %s39_s27 = ssub.s32 %s877_s20, %s1243_s13 }
  0x3a   : > { %p36_p7 = scmp.ge.s32.totalorder %s1245_s14, 2  ;;  %s620_s8 = smul.u32 24, %s194_s23 }
  0x3b   : > { %s203_s25 = sadd.s32 %s877_s20, %s621_s24  ;;  %s1058_s24 = scalar_lea.sflag [#allocation3], %s194_s23 }
  0x3c   : > { %s1247_s14 = smov (%p36_p7, %s1245_s14), 0  ;;  %s576_s11 = sshll.u32 %s203_s25, 6 }
  0x3d   : > { %s38_s7 = ssub.s32 %s881_s21, %s1247_s14  ;;  %s1051_s10 = scalar_lea.hbm %s1197_s0, %s576_s11 }
  0x3e   : > { %s1053_s1 = sor.u32 %s39_s27, %s38_s7  ;;  %s198_s13 = scalar_lea.vmem [#allocation2], %s620_s8 }
  0x3f   : > { %s206_s30 = sshll.u32 %s198_s13, 4  ;;  %p41_p8 = scmp.eq.s32.totalorder %s1053_s1, 0  ;;  %s1056_s30 = int_to_ptr.vmem [resolvable:$true] %s206_s30 }
  0x40   : > { %s753_s25 = scalar_lea.hbm %s1051_s10, 384  ;;  %p755_p1 = pneg %p1224_p12 }
  0x41   : > { %p754_p9 = scmp.ne.s32.totalorder %s1051_s10, %s753_s25  ;;  %s758_s27 = scalar_lea.hbm %s1197_s0, 1536 }
  0x42   : > { %p759_p6 = scmp.lt.u32.totalorder %s1051_s10, %s1197_s0  ;;  %p760_p10 = scmp.lt.u32.totalorder %s758_s27, %s753_s25 }
  0x43   : > { %p756_p2 = pnand %p755_p1, %p754_p9  ;;  %p762_p13 = scmp.lt.u32.totalorder %s753_s25, %s1051_s10 }
  0x44   : > { %p761_p11 = por %p760_p10, %p759_p6 }
  0x45   : > { %p757_p4 = pneg %p756_p2 }
  0x46   : > { %p763_p5 = por %p762_p13, %p761_p11 }
  0x48   : > { %p764_p0 = pnand %p763_p5, %p757_p4 }
  0x4a   : > { %767 = shalt.err (!%p764_p0)
}
  0x4b   : > { %s768_s13 = scalar_lea.vmem %s1056_s30, 384  ;;  %s890_s23 = smov [#allocation2]  }
  0x4c   : > { %p769_p3 = scmp.ne.s32.totalorder %s1056_s30, %s768_s13  ;;  %s773_s12 = sshll.u32 %s890_s23, 4  ;;  %s774_s12 = int_to_ptr.vmem [resolvable:$false] %s773_s12 }
  0x4d   : > { %s775_s6 = scalar_lea.vmem %s774_s12, 768  ;;  %p776_p2 = scmp.lt.s32.totalorder %s1056_s30, %s774_s12 }
  0x4e   : > { %p771_p7 = pnand %p769_p3, %p755_p1  ;;  %p777_p6 = scmp.lt.s32.totalorder %s775_s6, %s768_s13 }
  0x50   : > { %p772_p9 = pneg %p771_p7  ;;  %p778_p10 = por %p777_p6, %p776_p2 }
  0x52   : > { %p779_p11 = pnand %p778_p10, %p772_p9 }
  0x54   : > { %782 = shalt.err (!%p779_p11)
}
  0x55   : > { %s891_s25 = smov 128   ;;  %s1225_s11 = smov 4  }
  0x56   : > { %s1226_s27 = smov 64   ;;  %s1227_s7 = sadd.s32 1, %s865_s17 }
  0x57   : > { %638 = dma.hbm_to_vmem [thread:$0]  (!%p1224_p12), %s1051_s10, 384, %s1056_s30, %s1058_s24, %s891_s25, %s1226_s27, %s1225_s11  }
  0x58   : > { %s1093_s8 = scalar_select %p41_p8, %s865_s17, %s1227_s7  }
  0x59   : > { %p1228_p1 = scmp.ne.s32.totalorder %s1219_s5, 0 }
  0x5a   : > { %s1098_s13 = sand.u32 (!%p1228_p1), 1, %s861_s16   ;;  %p1229_p4 = scmp.ne.s32.totalorder (!%p1228_p1), %s1215_s28, 0 }
  0x5b   : > { %218 = sbr.rel (%p1228_p1) target bundleno = 483 (0x1e3), region = 28  ;;  %s221_s23 = scalar_lea.sflag (!%p1228_p1), [#allocation3], %s1098_s13 }
  0x5c   : > { %s622_s9 = smul.u32 (!%p1228_p1), 24, %s1098_s13 }
  0x5e   : > { %s224_s12 = scalar_lea.vmem (!%p1228_p1), [#allocation2], %s622_s9 }
  0x62   : > { %844 = dma.done.wait (%p1229_p4), %s221_s23, 384  }
  0x63   : > { %846 = vsyncadd (%p1229_p4), %s221_s23, 4294966912  ;;  %p1230_p8 = scmp.ne.s32.totalorder %s1213_s26, 0 }
  0x65   : > { %848 = dma.done.wait (%p1230_p8), [#allocation6], 128  }
  0x66   : > { %850 = vsyncadd (%p1230_p8), [#allocation6], 4294967168  ;;  %p263_p12 = scmp.lt.s32.totalorder %s873_s19, 1  ;;  %v892_v0 = vmov 0.0   ;;  %vm893_vm0 = vmmov 0   ;;  %v721_v1 = vld [vmem:[%s224_s12] sm:$0xff]  }
  0x67   : > { %610 = vmatprep.subr.bf16.mxu0 %v892_v0  ;;  %616 = vmatprep.mubr.msk.bf16.mxu0 %vm893_vm0, %v892_v0  ;;  %v722_v2 = vld [vmem:[%s224_s12 + $0x8] sm:$0xff]   ;;  %v723_v3 = vld [vmem:[%s224_s12 + $0x10] sm:$0xff]   ;;  %vm305_vm1 = vcmask 392192   ;;  %s579_s25 = sshll.u32 %s1098_s13, 3  ;;  %p591_p13 = scmp.ne.s32.totalorder %s869_s18, 0 }
  0x68   : > { %s264_s1 = scalar_select %p263_p12, %s873_s19, 1  ;;  %611 = vmatpush3.bf16.msra.mxu0 %v721_v1  ;;  %v724_v4 = vld [vmem:[#allocation5] sm:$0xff]  }
  0x69   : > { %612 = vmatprep.subr.bf16.mxu0 %v892_v0  ;;  %s248_s11 = scalar_lea.vmem [#allocation7], %s579_s25  ;;  %vm364_vm2 = vcmask (!%p591_p13), 7168   ;;  %v894_v10 = vmov (!%p591_p13), 0.0  }
  0x6a   : > { %s597_s30 = sshll.u32 %s264_s1, 4 }
  0x6b   : > { %s1115_s28 = scalar_lea.vmem %s1200_s3, %s597_s30  ;;  %s1120_s26 = scalar_lea.vmem %s1201_s4, %s597_s30 }
  0x6c   : > { %613 = vmatpush3.bf16.msra.mxu0 %v722_v2  ;;  %365 = vst.msk [vmem:[%s1115_s28] sm:$0xff] (!%p591_p13), %vm364_vm2, %v894_v10  ;;  %366 = vst.msk [vmem:[%s1115_s28 + $0x8] sm:$0xff] (!%p591_p13), %vm364_vm2, %v894_v10 }
  0x6d   : > { %614 = vmatprep.subr.bf16.mxu0 %v892_v0  ;;  %367 = vst.msk [vmem:[%s1120_s26] sm:$0xff] (!%p591_p13), %vm364_vm2, %v894_v10  ;;  %368 = vst.msk [vmem:[%s1120_s26 + $0x8] sm:$0xff] (!%p591_p13), %vm364_vm2, %v894_v10 }
  0x70   : > { %615 = vmatpush3.bf16.msra.mxu0 %v723_v3 }
  0x73   : > { %617 = vmatmul.mubr.msk.bf16.vlgmr.msra.gmra.mrb[0].mxu0 %vm305_vm1, %v724_v4 }
 0x145   : > { %363 = sbr.rel (%p591_p13) target bundleno = 332 (0x14c), region = 40 }
 0x146   : > { %v343_v5 = vpop.f32.mrb[0].mxu0 }
 0x147   : > { %v618_v6 = vpop.f32.mrb[1].mxu0 }
 0x148   : > { %v346_v7 = vpop.f32.mrb[2].mxu0 }
 0x149   : > { %v604_v8 = vpack.c.bf16 %v346_v7, %v343_v5  ;;  %v619_v9 = vpop.f32.mrb[3].mxu0 }
 0x14b   : > { %605 = vst [vmem:[%s248_s11] sm:$0xff] %v604_v8  }
 0x14c PF: > { %371 = vadd.xlane.f32.xlu0 %v343_v5  ;;  %v382_v11 = vmul.f32 %v343_v5, %v343_v5  ;;  %v383_v12 = vmul.f32 %v346_v7, %v346_v7  ;;  %s593_s27 = sshll.u32 %s873_s19, 2  ;;  %s417_s23 = sshll.u32 %s248_s11, 4  ;;  %s1135_s23 = int_to_ptr.vmem [resolvable:$true] %s417_s23 }
 0x14d   : > { %s414_s7 = sadd.s32 %s869_s18, %s593_s27  ;;  %s393_s5 = scalar_lea.sflag [#allocation4], %s1098_s13 }
 0x14e   : > { %384 = vadd.xlane.f32.xlu1 %v382_v11  ;;  %s594_s9 = sshll.u32 %s414_s7, 6  ;;  %s783_s10 = scalar_lea.vmem %s1135_s23, 128 }
 0x14f   : > { %s1133_s30 = scalar_lea.hbm %s1199_s2, %s594_s9  ;;  %p784_p5 = scmp.ne.s32.totalorder %s1135_s23, %s783_s10 }
 0x150   : > { %373 = vadd.xlane.f32.xlu0 %v346_v7  ;;  %p1231_p0 = scmp.ne.s32.totalorder %s1216_s29, 0  ;;  %s895_s19 = smov [#allocation7]  }
 0x151   : > { %s787_s18 = sshll.u32 %s895_s19, 4  ;;  %s788_s18 = int_to_ptr.vmem [resolvable:$false] %s787_s18 }
 0x152   : > { %386 = vadd.xlane.f32.xlu1 %v383_v12  ;;  %p785_p3 = pnand %p784_p5, %p1231_p0  ;;  %s789_s24 = scalar_lea.vmem %s788_s18, 256 }
 0x153   : > { %p790_p9 = scmp.lt.s32.totalorder %s1135_s23, %s788_s18  ;;  %p791_p2 = scmp.lt.s32.totalorder %s789_s24, %s783_s10 }
 0x154   : > { %p786_p7 = pneg %p785_p3 }
 0x155   : > { %p792_p6 = por %p791_p2, %p790_p9 }
 0x157   : > { %p793_p10 = pnand %p792_p6, %p786_p7 }
 0x159   : > { %796 = shalt.err (!%p793_p10)
}
 0x15a   : > { %s797_s6 = scalar_lea.hbm %s1133_s30, 128  ;;  %s801_s27 = scalar_lea.hbm %s1199_s2, 512 }
 0x15b   : > { %p798_p11 = scmp.ne.s32.totalorder %s1133_s30, %s797_s6  ;;  %p802_p8 = scmp.lt.u32.totalorder %s1133_s30, %s1199_s2 }
 0x15c   : > { %p803_p12 = scmp.lt.u32.totalorder %s801_s27, %s797_s6  ;;  %p805_p5 = scmp.lt.u32.totalorder %s797_s6, %s1133_s30 }
 0x15d   : > { %p799_p1 = pnand %p798_p11, %p1231_p0 }
 0x15e   : > { %p804_p13 = por %p803_p12, %p802_p8 }
 0x15f   : > { %p800_p4 = pneg %p799_p1 }
 0x160   : > { %p806_p3 = por %p805_p5, %p804_p13 }
 0x162   : > { %p807_p7 = pnand %p806_p3, %p800_p4 }
 0x164   : > { %810 = shalt.err (!%p807_p7)
}
 0x165   : > { %s896_s12 = smov 64   ;;  %s897_s1 = smov 128   ;;  %v369_v13 = vld [vmem:[%s1115_s28] sm:$0xff]  ;;  %vm377_vm3 = vcmask 7168   ;;  %v370_v18 = vld [vmem:[%s1115_s28 + $0x8] sm:$0xff] }
 0x166   : > { %s898_s10 = smov 4   ;;  %v380_v15 = vld [vmem:[%s1120_s26] sm:$0xff]  ;;  %v381_v21 = vld [vmem:[%s1120_s26 + $0x8] sm:$0xff] }
 0x167   : > { %629 = dma.vmem_to_hbm [thread:$0]  (%p1231_p0), %s1135_s23, 128, %s1133_s30, %s393_s5, %s896_s12, %s897_s1, %s898_s10  }
 0x1d9   : > { %v372_v14 = vpop.xlane.xlu0 %371 }
 0x1da   : > { %v375_v16 = vadd.f32 %v372_v14, %v369_v13 }
 0x1db   : > { %v385_v17 = vpop.xlane.xlu1 %384 }
 0x1dc   : > { %378 = vst.msk [vmem:[%s1115_s28] sm:$0xff] %vm377_vm3, %v375_v16  ;;  %v388_v19 = vadd.f32 %v385_v17, %v380_v15 }
 0x1dd   : > { %v374_v20 = vpop.xlane.xlu0 %373 }
 0x1de   : > { %390 = vst.msk [vmem:[%s1120_s26] sm:$0xff] %vm377_vm3, %v388_v19  ;;  %v376_v22 = vadd.f32 %v374_v20, %v370_v18 }
 0x1df   : > { %v387_v23 = vpop.xlane.xlu1 %386 }
 0x1e0   : > { %379 = vst.msk [vmem:[%s1115_s28 + $0x8] sm:$0xff] %vm377_vm3, %v376_v22  ;;  %v389_v24 = vadd.f32 %v387_v23, %v381_v21 }
 0x1e2   : > { %391 = vst.msk [vmem:[%s1120_s26 + $0x8] sm:$0xff] %vm377_vm3, %v389_v24 }
 0x1e3 PF: > { %s1232_s29 = sld [smem:[#allocation11_spill]]  ;;  %p646_p0 = scmp.ge.s32.totalorder %s885_s22, 2 }
 0x1e4   : > { %s438_s13 = sand.u32 1, %s857_s15  }
 0x1e5   : > { %s439_s23 = scalar_lea.sflag [#allocation4], %s438_s13 }
 0x1e9   : > { %p1233_p9 = scmp.ne.s32.totalorder %s1232_s29, 0 }
 0x1eb   : > { %p640_p2 = pnand %p646_p0, %p1233_p9 }
 0x1ed   : > { %852 = dma.done.wait (!%p640_p2), %s439_s23, 128  }
 0x1ee   : > { %854 = vsyncadd (!%p640_p2), %s439_s23, 4294967168  ;;  %s22_s22 = sadd.s32 1, %s885_s22   ;;  %s1234_s28 = sld [smem:[#allocation12_spill]] }
 0x1ef   : > { %p19_p6 = scmp.ge.s32.totalorder %s22_s22, 6   ;;  %s1235_s15 = smov %s861_s16 }
 0x1f0   : > { %s1236_s16 = smov %s865_s17  ;;  %s1237_s17 = smov %s1093_s8 }
 0x1f1   : > { %s1238_s18 = smov %s877_s20  ;;  %s1239_s19 = smov %s881_s21 }
 0x1f2   : > { %s1241_s21 = smov %s1247_s14  ;;  %21 = sbr.rel (!%p19_p6) target bundleno = 10 (0xa), region = 105 }
 0x1f4   : > { %s1240_s20 = smov %s1234_s28 }
 0x1f9   :  { %460 = vsyncpa [#allocation3], 1 }
 0x1fa   :  { %462 = vsyncpa [#allocation3 + $0x1], 1 }
 0x1fb   :  { %463 = vsyncpa [#allocation6], 1 }
 0x1fc   :  { %464 = vsyncpa [#allocation4], 1 }
 0x1fd   :  { %466 = vsyncpa [#allocation4 + $0x1], 1 }

</bundles_post_ra>
